<compile_context>
chip_gen: v5e
topology: v5e:2x2
jax: 0.10.0
libtpu: 0.0.40
codegen_flags: <defaults>
</compile_context>

<pallas_src>
import functools
from math import sqrt

import jax
import jax.numpy as jnp
from jax.experimental import pallas as pl
from jax.experimental.pallas import tpu as pltpu

LANES = 128  # TPU vreg lane count


def mha_kernel(x_ref, wqkv_ref, bqkv_ref, wo_ref, bo_ref, out_ref, *,
               num_heads, head_dim, seq_len, batch_block, emb_dim):
    """One grid step == one batch block (batch_block batch elements).

    x_ref    : [Bt, S, 128]    f32 input block, zero-padded beyond E (lane-dense loads)
    wqkv_ref : [128, 3E]       bf16 block-diagonal fused QKV weights (pre-transposed,
                               1/sqrt(D) folded into the Q columns; rows >= E are zero)
    bqkv_ref : [1, 3E]         f32 fused QKV bias (Q bias pre-scaled)
    wo_ref   : [H, D, 128]     bf16 per-head output projection rows (pre-transposed,
                               output lanes >= E are zero)
    bo_ref   : [1, 128]        f32 output bias (zero beyond E)
    out_ref  : [Bt, S, 128]    f32 output block (lanes >= E are zero, sliced off outside)
    """
    E, D, H, S, Bt = emb_dim, head_dim, num_heads, seq_len, batch_block
    EP = LANES
    rows = Bt * S

    # Lane-dense load; merging (Bt, S) into rows is layout-trivial (S == 8 native
    # sublanes); cast to bf16 only after the 32-bit reshape.
    x = x_ref[...].reshape(rows, EP).astype(jnp.bfloat16)

    # Fused block-diagonal QKV projection: a single MXU pass (K padded to 128; the
    # zero weight rows cancel the zero-padded x lanes).  f32 accumulate + bias.
    qkv = jnp.dot(x, wqkv_ref[...],
                  preferred_element_type=jnp.float32) + bqkv_ref[...]     # [rows, 3E]

    # Lane-dense f32 output accumulator (w_o columns >= E are zero).
    acc = jnp.zeros((rows, EP), jnp.float32)

    # Per-head attention, batched over the batch block: scores / softmax / PV /
    # output projection each act on all Bt batch elements at once.
    for h in range(H):                                   # H tiny -> static unroll
        c = h * D
        q = qkv[:, c:c + D].reshape(Bt, S, D).astype(jnp.bfloat16)
        k = qkv[:, E + c:E + c + D].reshape(Bt, S, D).astype(jnp.bfloat16)
        v = qkv[:, 2 * E + c:2 * E + c + D].reshape(Bt, S, D).astype(jnp.bfloat16)

        # scale already folded into q's weights/bias; no transposes materialized.
        s = jnp.einsum("bqd,bkd->bqk", q, k,
                       preferred_element_type=jnp.float32)               # [Bt,S,S] f32

        # numerically-stable softmax, f32 math; divide -> EUP reciprocal
        s = s - jnp.max(s, axis=-1, keepdims=True)
        p = jnp.exp(s)
        p = p * pl.reciprocal(jnp.sum(p, axis=-1, keepdims=True), approx=True)

        o = jnp.einsum("bqk,bkd->bqd", p.astype(jnp.bfloat16), v,
                       preferred_element_type=jnp.float32)               # [Bt,S,D] f32

        # Project and accumulate directly (no bf16 scratch round-trip).
        acc = acc + jnp.dot(o.reshape(rows, D).astype(jnp.bfloat16),
                            wo_ref[h],
                            preferred_element_type=jnp.float32)          # [rows,128] f32

    out = acc + bo_ref[...]
    # Unmasked 128-lane stores; splitting rows back into (Bt, S) is layout-trivial.
    out_ref[...] = out.reshape(Bt, S, EP).astype(out_ref.dtype)


def _num_tensorcores_per_chip():
    try:
        kind = jax.devices()[0].device_kind.lower()
    except Exception:
        return 1
    return 2 if ("v7" in kind or "7x" in kind or "v4" in kind) else 1


def _pick_batch_block(batch):
    """One big step on single-TC chips (v5e/v6e); exactly 2 parallel steps on 2-TC chips."""
    if _num_tensorcores_per_chip() >= 2 and batch >= 2:
        bb = batch // 2 if batch % 2 == 0 else 1
    else:
        bb = batch
    while batch % bb:
        bb -= 1
    return max(bb, 1)


def multi_head_attention(x, params, *, num_heads, batch_block=None):
    """x: [B, S, E] float32. params: dict of stacked per-head weights. Returns [B, S, E]."""
    B, S, E = x.shape
    assert E % num_heads == 0
    assert S % 8 == 0, "toy kernel assumes S is a multiple of the native sublane count"
    D = E // num_heads
    EP = LANES
    assert E <= EP  # TODO(synk): tile E (and flash-tile S) for realistic model sizes.
    scale = 1.0 / sqrt(float(D))
    if batch_block is None:
        batch_block = _pick_batch_block(B)
    assert B % batch_block == 0

    # ---- host-side weight packing (free layout plumbing, outside the kernel) ----
    bd = jax.scipy.linalg.block_diag
    wq_bd = bd(*[params["wq"][h].T * scale for h in range(num_heads)])    # [E,E]
    wk_bd = bd(*[params["wk"][h].T for h in range(num_heads)])            # [E,E]
    wv_bd = bd(*[params["wv"][h].T for h in range(num_heads)])            # [E,E]
    wqkv = jnp.concatenate([wq_bd, wk_bd, wv_bd], axis=1)                 # [E,3E]
    wqkv = jnp.pad(wqkv, ((0, EP - E), (0, 0))).astype(jnp.bfloat16)      # [128,3E]
    bqkv = jnp.concatenate([params["bq"].reshape(-1) * scale,
                            params["bk"].reshape(-1),
                            params["bv"].reshape(-1)])[None, :].astype(jnp.float32)  # [1,3E]
    wo_t = jnp.pad(params["wo"].T, ((0, 0), (0, EP - E)))                 # [E,128]
    wo_h = wo_t.reshape(num_heads, D, EP).astype(jnp.bfloat16)            # [H,D,128]
    bo = jnp.pad(params["bo"], (0, EP - E))[None, :].astype(jnp.float32)  # [1,128]
    x_pad = jnp.pad(x, ((0, 0), (0, 0), (0, EP - E)))                     # [B,S,128] f32

    kernel = functools.partial(mha_kernel, num_heads=num_heads, head_dim=D,
                               seq_len=S, batch_block=batch_block, emb_dim=E)

    inv = lambda shape: pl.BlockSpec(shape, lambda b: (0,) * len(shape))
    # NOTE: the grid-invariant weight specs below could carry pipeline_mode=pl.Buffered(1)
    # to drop the redundant double buffer; negligible at <50 KB, mandatory at large E.

    out = pl.pallas_call(
        kernel,
        out_shape=jax.ShapeDtypeStruct((B, S, EP), jnp.float32),
        grid_spec=pltpu.PrefetchScalarGridSpec(
            num_scalar_prefetch=0,
            grid=(B // batch_block,),
            in_specs=[
                pl.BlockSpec((batch_block, S, EP), lambda b: (b, 0, 0)),  # x (padded)
                inv((EP, 3 * E)),                                         # fused W_qkv
                inv((1, 3 * E)),                                          # fused b_qkv
                inv((num_heads, D, EP)),                                  # W_o (head-stacked)
                inv((1, EP)),                                             # b_o
            ],
            out_specs=pl.BlockSpec((batch_block, S, EP), lambda b: (b, 0, 0)),
        ),
        compiler_params=pltpu.CompilerParams(
            dimension_semantics=("parallel",)),
    )(x_pad, wqkv, bqkv, wo_h, bo)
    return out[:, :, :E].astype(x.dtype)


def reference_mha(x, params, *, num_heads):
    """Pure-JAX f32 reference mirroring the PyTorch module exactly."""
    B, S, E = x.shape
    D = E // num_heads
    scale = 1.0 / sqrt(float(D))
    outs = []
    for h in range(num_heads):
        xh = x[:, :, h * D:(h + 1) * D]
        q = jnp.einsum("bsd,ed->bse", xh, params["wq"][h]) + params["bq"][h]
        k = jnp.einsum("bsd,ed->bse", xh, params["wk"][h]) + params["bk"][h]
        v = jnp.einsum("bsd,ed->bse", xh, params["wv"][h]) + params["bv"][h]
        s = jnp.einsum("bqd,bkd->bqk", q, k) * scale
        p = jax.nn.softmax(s, axis=-1)
        outs.append(jnp.einsum("bqk,bkd->bqd", p, v))
    values = jnp.concatenate(outs, axis=-1)
    return jnp.einsum("bse,fe->bsf", values, params["wo"]) + params["bo"]


def init_params(key, emb_dim, num_heads):
    D = emb_dim // num_heads
    keys = jax.random.split(key, 8)
    scale_h = 1.0 / sqrt(float(D))
    scale_o = 1.0 / sqrt(float(emb_dim))
    return {
        "wq": jax.random.uniform(keys[0], (num_heads, D, D), jnp.float32, -scale_h, scale_h),
        "bq": jax.random.uniform(keys[1], (num_heads, D), jnp.float32, -scale_h, scale_h),
        "wk": jax.random.uniform(keys[2], (num_heads, D, D), jnp.float32, -scale_h, scale_h),
        "bk": jax.random.uniform(keys[3], (num_heads, D), jnp.float32, -scale_h, scale_h),
        "wv": jax.random.uniform(keys[4], (num_heads, D, D), jnp.float32, -scale_h, scale_h),
        "bv": jax.random.uniform(keys[5], (num_heads, D), jnp.float32, -scale_h, scale_h),
        "wo": jax.random.uniform(keys[6], (emb_dim, emb_dim), jnp.float32, -scale_o, scale_o),
        "bo": jax.random.uniform(keys[7], (emb_dim,), jnp.float32, -scale_o, scale_o),
    }


if __name__ == "__main__":
    batch, seq_len, emb_dim, num_heads = 2, 8, 32, 4

    key = jax.random.PRNGKey(0)
    kx, kp = jax.random.split(key)
    x = jax.random.normal(kx, (batch, seq_len, emb_dim), dtype=jnp.float32)
    params = init_params(kp, emb_dim, num_heads)

    out = multi_head_attention(x, params, num_heads=num_heads)
    out = jax.block_until_ready(out)

    ref = reference_mha(x, params, num_heads=num_heads)
    assert out.shape == (batch, seq_len, emb_dim)
    # bf16 MXU operands with f32 accumulation -> bf16-appropriate tolerance
    assert jnp.allclose(out, ref, atol=2e-2, rtol=2e-2), "mismatch vs reference"

    print("KERNEL_OK")
</pallas_src>

<mosaic_0001>
module attributes {stable_mosaic.version = 11 : i64} {
  func.func @mha_kernel(%arg0: i32, %arg1: memref<2x8x128xf32, #tpu.memory_space<vmem>>, %arg2: memref<128x96xbf16, #tpu.memory_space<vmem>>, %arg3: memref<1x96xf32, #tpu.memory_space<vmem>>, %arg4: memref<4x8x128xbf16, #tpu.memory_space<vmem>>, %arg5: memref<1x128xf32, #tpu.memory_space<vmem>>, %arg6: memref<2x8x128xf32, #tpu.memory_space<vmem>>) attributes {dimension_semantics = [#tpu.dimension_semantics<parallel>], iteration_bounds = array<i64: 1>, scalar_prefetch = 0 : i64, scratch_operands = 0 : i64, tpu.core_type = #tpu.core_type<tc>, window_params = [{transform_indices = @transform_0, window_bounds = array<i64: 2, 8, 128>}, {pipeline_mode = #tpu.pipeline_mode<synchronous>, transform_indices = @transform_1, window_bounds = array<i64: 128, 96>}, {pipeline_mode = #tpu.pipeline_mode<synchronous>, transform_indices = @transform_2, window_bounds = array<i64: 1, 96>}, {pipeline_mode = #tpu.pipeline_mode<synchronous>, transform_indices = @transform_3, window_bounds = array<i64: 4, 8, 128>}, {pipeline_mode = #tpu.pipeline_mode<synchronous>, transform_indices = @transform_4, window_bounds = array<i64: 1, 128>}, {transform_indices = @transform_5, window_bounds = array<i64: 2, 8, 128>}]} {
    %c0 = arith.constant 0 : index
    %c0_0 = arith.constant 0 : index
    %c0_1 = arith.constant 0 : index
    %0 = vector.load %arg1[%c0, %c0_0, %c0_1] : memref<2x8x128xf32, #tpu.memory_space<vmem>>, vector<2x8x128xf32>
    %1 = vector.shape_cast %0 : vector<2x8x128xf32> to vector<16x128xf32>
    %2 = arith.truncf %1 : vector<16x128xf32> to vector<16x128xbf16>
    %c0_2 = arith.constant 0 : index
    %c0_3 = arith.constant 0 : index
    %3 = vector.load %arg2[%c0_2, %c0_3] : memref<128x96xbf16, #tpu.memory_space<vmem>>, vector<128x96xbf16>
    %cst = arith.constant dense<0.000000e+00> : vector<16x96xf32>
    %4 = tpu.matmul %2, %3, %cst {dimension_numbers = #tpu.dot_dimension_numbers<[1], [0], [0], [1], [0, 0, 1, 1], [], []>} : vector<16x128xbf16>, vector<128x96xbf16>, vector<16x96xf32> -> vector<16x96xf32>
    %c0_4 = arith.constant 0 : index
    %c0_5 = arith.constant 0 : index
    %5 = vector.load %arg3[%c0_4, %c0_5] : memref<1x96xf32, #tpu.memory_space<vmem>>, vector<1x96xf32>
    %6 = vector.broadcast %5 : vector<1x96xf32> to vector<16x96xf32>
    %7 = arith.addf %4, %6 : vector<16x96xf32>
    %cst_6 = arith.constant 0.000000e+00 : f32
    %8 = vector.broadcast %cst_6 : f32 to vector<16x128xf32>
    %9 = vector.extract_strided_slice %7 {offsets = [0, 0], sizes = [16, 8], strides = [1, 1]} : vector<16x96xf32> to vector<16x8xf32>
    %10 = vector.shape_cast %9 : vector<16x8xf32> to vector<2x8x8xf32>
    %11 = arith.truncf %10 : vector<2x8x8xf32> to vector<2x8x8xbf16>
    %12 = vector.extract_strided_slice %7 {offsets = [0, 32], sizes = [16, 8], strides = [1, 1]} : vector<16x96xf32> to vector<16x8xf32>
    %13 = vector.shape_cast %12 : vector<16x8xf32> to vector<2x8x8xf32>
    %14 = arith.truncf %13 : vector<2x8x8xf32> to vector<2x8x8xbf16>
    %15 = vector.extract_strided_slice %7 {offsets = [0, 64], sizes = [16, 8], strides = [1, 1]} : vector<16x96xf32> to vector<16x8xf32>
    %16 = vector.shape_cast %15 : vector<16x8xf32> to vector<2x8x8xf32>
    %17 = arith.truncf %16 : vector<2x8x8xf32> to vector<2x8x8xbf16>
    "tpu.trace_start"() <{level = 10 : i32, message = "bqd,bkd->bqk"}> : () -> ()
    %cst_7 = arith.constant dense<0.000000e+00> : vector<2x8x8xf32>
    %18 = tpu.matmul %11, %14, %cst_7 {dimension_numbers = #tpu.dot_dimension_numbers<[2], [2], [1], [1], [0, 0, 0, 1, 1, 1], [0], [0]>} : vector<2x8x8xbf16>, vector<2x8x8xbf16>, vector<2x8x8xf32> -> vector<2x8x8xf32>
    "tpu.trace_stop"() : () -> ()
    %cst_8 = arith.constant dense<0xFF800000> : vector<2x8xf32>
    %19 = vector.multi_reduction <maximumf>, %18, %cst_8 [2] : vector<2x8x8xf32> to vector<2x8xf32>
    %20 = vector.shape_cast %19 : vector<2x8xf32> to vector<2x8x1xf32>
    %21 = vector.broadcast %20 : vector<2x8x1xf32> to vector<2x8x8xf32>
    %22 = arith.subf %18, %21 : vector<2x8x8xf32>
    %23 = math.exp %22 : vector<2x8x8xf32>
    %cst_9 = arith.constant dense<0.000000e+00> : vector<2x8xf32>
    %24 = vector.multi_reduction <add>, %23, %cst_9 [2] : vector<2x8x8xf32> to vector<2x8xf32>
    %25 = vector.shape_cast %24 : vector<2x8xf32> to vector<2x8x1xf32>
    %26 = tpu.reciprocal %25 {approx = true} : vector<2x8x1xf32> -> vector<2x8x1xf32>
    %27 = vector.broadcast %26 : vector<2x8x1xf32> to vector<2x8x8xf32>
    %28 = arith.mulf %23, %27 : vector<2x8x8xf32>
    %29 = arith.truncf %28 : vector<2x8x8xf32> to vector<2x8x8xbf16>
    "tpu.trace_start"() <{level = 10 : i32, message = "bqk,bkd->bqd"}> : () -> ()
    %cst_10 = arith.constant dense<0.000000e+00> : vector<2x8x8xf32>
    %30 = tpu.matmul %29, %17, %cst_10 {dimension_numbers = #tpu.dot_dimension_numbers<[2], [1], [1], [2], [0, 0, 0, 1, 1, 2], [0], [0]>} : vector<2x8x8xbf16>, vector<2x8x8xbf16>, vector<2x8x8xf32> -> vector<2x8x8xf32>
    "tpu.trace_stop"() : () -> ()
    %31 = vector.shape_cast %30 : vector<2x8x8xf32> to vector<16x8xf32>
    %32 = arith.truncf %31 : vector<16x8xf32> to vector<16x8xbf16>
    %c0_11 = arith.constant 0 : index
    %c0_12 = arith.constant 0 : index
    %c0_13 = arith.constant 0 : index
    %33 = vector.load %arg4[%c0_11, %c0_12, %c0_13] : memref<4x8x128xbf16, #tpu.memory_space<vmem>>, vector<1x8x128xbf16>
    %34 = vector.shape_cast %33 : vector<1x8x128xbf16> to vector<8x128xbf16>
    %cst_14 = arith.constant dense<0.000000e+00> : vector<16x128xf32>
    %35 = tpu.matmul %32, %34, %cst_14 {dimension_numbers = #tpu.dot_dimension_numbers<[1], [0], [0], [1], [0, 0, 1, 1], [], []>} : vector<16x8xbf16>, vector<8x128xbf16>, vector<16x128xf32> -> vector<16x128xf32>
    %36 = arith.addf %8, %35 : vector<16x128xf32>
    %37 = vector.extract_strided_slice %7 {offsets = [0, 8], sizes = [16, 8], strides = [1, 1]} : vector<16x96xf32> to vector<16x8xf32>
    %38 = vector.shape_cast %37 : vector<16x8xf32> to vector<2x8x8xf32>
    %39 = arith.truncf %38 : vector<2x8x8xf32> to vector<2x8x8xbf16>
    %40 = vector.extract_strided_slice %7 {offsets = [0, 40], sizes = [16, 8], strides = [1, 1]} : vector<16x96xf32> to vector<16x8xf32>
    %41 = vector.shape_cast %40 : vector<16x8xf32> to vector<2x8x8xf32>
    %42 = arith.truncf %41 : vector<2x8x8xf32> to vector<2x8x8xbf16>
    %43 = vector.extract_strided_slice %7 {offsets = [0, 72], sizes = [16, 8], strides = [1, 1]} : vector<16x96xf32> to vector<16x8xf32>
    %44 = vector.shape_cast %43 : vector<16x8xf32> to vector<2x8x8xf32>
    %45 = arith.truncf %44 : vector<2x8x8xf32> to vector<2x8x8xbf16>
    "tpu.trace_start"() <{level = 10 : i32, message = "bqd,bkd->bqk"}> : () -> ()
    %cst_15 = arith.constant dense<0.000000e+00> : vector<2x8x8xf32>
    %46 = tpu.matmul %39, %42, %cst_15 {dimension_numbers = #tpu.dot_dimension_numbers<[2], [2], [1], [1], [0, 0, 0, 1, 1, 1], [0], [0]>} : vector<2x8x8xbf16>, vector<2x8x8xbf16>, vector<2x8x8xf32> -> vector<2x8x8xf32>
    "tpu.trace_stop"() : () -> ()
    %cst_16 = arith.constant dense<0xFF800000> : vector<2x8xf32>
    %47 = vector.multi_reduction <maximumf>, %46, %cst_16 [2] : vector<2x8x8xf32> to vector<2x8xf32>
    %48 = vector.shape_cast %47 : vector<2x8xf32> to vector<2x8x1xf32>
    %49 = vector.broadcast %48 : vector<2x8x1xf32> to vector<2x8x8xf32>
    %50 = arith.subf %46, %49 : vector<2x8x8xf32>
    %51 = math.exp %50 : vector<2x8x8xf32>
    %cst_17 = arith.constant dense<0.000000e+00> : vector<2x8xf32>
    %52 = vector.multi_reduction <add>, %51, %cst_17 [2] : vector<2x8x8xf32> to vector<2x8xf32>
    %53 = vector.shape_cast %52 : vector<2x8xf32> to vector<2x8x1xf32>
    %54 = tpu.reciprocal %53 {approx = true} : vector<2x8x1xf32> -> vector<2x8x1xf32>
    %55 = vector.broadcast %54 : vector<2x8x1xf32> to vector<2x8x8xf32>
    %56 = arith.mulf %51, %55 : vector<2x8x8xf32>
    %57 = arith.truncf %56 : vector<2x8x8xf32> to vector<2x8x8xbf16>
    "tpu.trace_start"() <{level = 10 : i32, message = "bqk,bkd->bqd"}> : () -> ()
    %cst_18 = arith.constant dense<0.000000e+00> : vector<2x8x8xf32>
    %58 = tpu.matmul %57, %45, %cst_18 {dimension_numbers = #tpu.dot_dimension_numbers<[2], [1], [1], [2], [0, 0, 0, 1, 1, 2], [0], [0]>} : vector<2x8x8xbf16>, vector<2x8x8xbf16>, vector<2x8x8xf32> -> vector<2x8x8xf32>
    "tpu.trace_stop"() : () -> ()
    %59 = vector.shape_cast %58 : vector<2x8x8xf32> to vector<16x8xf32>
    %60 = arith.truncf %59 : vector<16x8xf32> to vector<16x8xbf16>
    %c1 = arith.constant 1 : index
    %c0_19 = arith.constant 0 : index
    %c0_20 = arith.constant 0 : index
    %61 = vector.load %arg4[%c1, %c0_19, %c0_20] : memref<4x8x128xbf16, #tpu.memory_space<vmem>>, vector<1x8x128xbf16>
    %62 = vector.shape_cast %61 : vector<1x8x128xbf16> to vector<8x128xbf16>
    %cst_21 = arith.constant dense<0.000000e+00> : vector<16x128xf32>
    %63 = tpu.matmul %60, %62, %cst_21 {dimension_numbers = #tpu.dot_dimension_numbers<[1], [0], [0], [1], [0, 0, 1, 1], [], []>} : vector<16x8xbf16>, vector<8x128xbf16>, vector<16x128xf32> -> vector<16x128xf32>
    %64 = arith.addf %36, %63 : vector<16x128xf32>
    %65 = vector.extract_strided_slice %7 {offsets = [0, 16], sizes = [16, 8], strides = [1, 1]} : vector<16x96xf32> to vector<16x8xf32>
    %66 = vector.shape_cast %65 : vector<16x8xf32> to vector<2x8x8xf32>
    %67 = arith.truncf %66 : vector<2x8x8xf32> to vector<2x8x8xbf16>
    %68 = vector.extract_strided_slice %7 {offsets = [0, 48], sizes = [16, 8], strides = [1, 1]} : vector<16x96xf32> to vector<16x8xf32>
    %69 = vector.shape_cast %68 : vector<16x8xf32> to vector<2x8x8xf32>
    %70 = arith.truncf %69 : vector<2x8x8xf32> to vector<2x8x8xbf16>
    %71 = vector.extract_strided_slice %7 {offsets = [0, 80], sizes = [16, 8], strides = [1, 1]} : vector<16x96xf32> to vector<16x8xf32>
    %72 = vector.shape_cast %71 : vector<16x8xf32> to vector<2x8x8xf32>
    %73 = arith.truncf %72 : vector<2x8x8xf32> to vector<2x8x8xbf16>
    "tpu.trace_start"() <{level = 10 : i32, message = "bqd,bkd->bqk"}> : () -> ()
    %cst_22 = arith.constant dense<0.000000e+00> : vector<2x8x8xf32>
    %74 = tpu.matmul %67, %70, %cst_22 {dimension_numbers = #tpu.dot_dimension_numbers<[2], [2], [1], [1], [0, 0, 0, 1, 1, 1], [0], [0]>} : vector<2x8x8xbf16>, vector<2x8x8xbf16>, vector<2x8x8xf32> -> vector<2x8x8xf32>
    "tpu.trace_stop"() : () -> ()
    %cst_23 = arith.constant dense<0xFF800000> : vector<2x8xf32>
    %75 = vector.multi_reduction <maximumf>, %74, %cst_23 [2] : vector<2x8x8xf32> to vector<2x8xf32>
    %76 = vector.shape_cast %75 : vector<2x8xf32> to vector<2x8x1xf32>
    %77 = vector.broadcast %76 : vector<2x8x1xf32> to vector<2x8x8xf32>
    %78 = arith.subf %74, %77 : vector<2x8x8xf32>
    %79 = math.exp %78 : vector<2x8x8xf32>
    %cst_24 = arith.constant dense<0.000000e+00> : vector<2x8xf32>
    %80 = vector.multi_reduction <add>, %79, %cst_24 [2] : vector<2x8x8xf32> to vector<2x8xf32>
    %81 = vector.shape_cast %80 : vector<2x8xf32> to vector<2x8x1xf32>
    %82 = tpu.reciprocal %81 {approx = true} : vector<2x8x1xf32> -> vector<2x8x1xf32>
    %83 = vector.broadcast %82 : vector<2x8x1xf32> to vector<2x8x8xf32>
    %84 = arith.mulf %79, %83 : vector<2x8x8xf32>
    %85 = arith.truncf %84 : vector<2x8x8xf32> to vector<2x8x8xbf16>
    "tpu.trace_start"() <{level = 10 : i32, message = "bqk,bkd->bqd"}> : () -> ()
    %cst_25 = arith.constant dense<0.000000e+00> : vector<2x8x8xf32>
    %86 = tpu.matmul %85, %73, %cst_25 {dimension_numbers = #tpu.dot_dimension_numbers<[2], [1], [1], [2], [0, 0, 0, 1, 1, 2], [0], [0]>} : vector<2x8x8xbf16>, vector<2x8x8xbf16>, vector<2x8x8xf32> -> vector<2x8x8xf32>
    "tpu.trace_stop"() : () -> ()
    %87 = vector.shape_cast %86 : vector<2x8x8xf32> to vector<16x8xf32>
    %88 = arith.truncf %87 : vector<16x8xf32> to vector<16x8xbf16>
    %c2 = arith.constant 2 : index
    %c0_26 = arith.constant 0 : index
    %c0_27 = arith.constant 0 : index
    %89 = vector.load %arg4[%c2, %c0_26, %c0_27] : memref<4x8x128xbf16, #tpu.memory_space<vmem>>, vector<1x8x128xbf16>
    %90 = vector.shape_cast %89 : vector<1x8x128xbf16> to vector<8x128xbf16>
    %cst_28 = arith.constant dense<0.000000e+00> : vector<16x128xf32>
    %91 = tpu.matmul %88, %90, %cst_28 {dimension_numbers = #tpu.dot_dimension_numbers<[1], [0], [0], [1], [0, 0, 1, 1], [], []>} : vector<16x8xbf16>, vector<8x128xbf16>, vector<16x128xf32> -> vector<16x128xf32>
    %92 = arith.addf %64, %91 : vector<16x128xf32>
    %93 = vector.extract_strided_slice %7 {offsets = [0, 24], sizes = [16, 8], strides = [1, 1]} : vector<16x96xf32> to vector<16x8xf32>
    %94 = vector.shape_cast %93 : vector<16x8xf32> to vector<2x8x8xf32>
    %95 = arith.truncf %94 : vector<2x8x8xf32> to vector<2x8x8xbf16>
    %96 = vector.extract_strided_slice %7 {offsets = [0, 56], sizes = [16, 8], strides = [1, 1]} : vector<16x96xf32> to vector<16x8xf32>
    %97 = vector.shape_cast %96 : vector<16x8xf32> to vector<2x8x8xf32>
    %98 = arith.truncf %97 : vector<2x8x8xf32> to vector<2x8x8xbf16>
    %99 = vector.extract_strided_slice %7 {offsets = [0, 88], sizes = [16, 8], strides = [1, 1]} : vector<16x96xf32> to vector<16x8xf32>
    %100 = vector.shape_cast %99 : vector<16x8xf32> to vector<2x8x8xf32>
    %101 = arith.truncf %100 : vector<2x8x8xf32> to vector<2x8x8xbf16>
    "tpu.trace_start"() <{level = 10 : i32, message = "bqd,bkd->bqk"}> : () -> ()
    %cst_29 = arith.constant dense<0.000000e+00> : vector<2x8x8xf32>
    %102 = tpu.matmul %95, %98, %cst_29 {dimension_numbers = #tpu.dot_dimension_numbers<[2], [2], [1], [1], [0, 0, 0, 1, 1, 1], [0], [0]>} : vector<2x8x8xbf16>, vector<2x8x8xbf16>, vector<2x8x8xf32> -> vector<2x8x8xf32>
    "tpu.trace_stop"() : () -> ()
    %cst_30 = arith.constant dense<0xFF800000> : vector<2x8xf32>
    %103 = vector.multi_reduction <maximumf>, %102, %cst_30 [2] : vector<2x8x8xf32> to vector<2x8xf32>
    %104 = vector.shape_cast %103 : vector<2x8xf32> to vector<2x8x1xf32>
    %105 = vector.broadcast %104 : vector<2x8x1xf32> to vector<2x8x8xf32>
    %106 = arith.subf %102, %105 : vector<2x8x8xf32>
    %107 = math.exp %106 : vector<2x8x8xf32>
    %cst_31 = arith.constant dense<0.000000e+00> : vector<2x8xf32>
    %108 = vector.multi_reduction <add>, %107, %cst_31 [2] : vector<2x8x8xf32> to vector<2x8xf32>
    %109 = vector.shape_cast %108 : vector<2x8xf32> to vector<2x8x1xf32>
    %110 = tpu.reciprocal %109 {approx = true} : vector<2x8x1xf32> -> vector<2x8x1xf32>
    %111 = vector.broadcast %110 : vector<2x8x1xf32> to vector<2x8x8xf32>
    %112 = arith.mulf %107, %111 : vector<2x8x8xf32>
    %113 = arith.truncf %112 : vector<2x8x8xf32> to vector<2x8x8xbf16>
    "tpu.trace_start"() <{level = 10 : i32, message = "bqk,bkd->bqd"}> : () -> ()
    %cst_32 = arith.constant dense<0.000000e+00> : vector<2x8x8xf32>
    %114 = tpu.matmul %113, %101, %cst_32 {dimension_numbers = #tpu.dot_dimension_numbers<[2], [1], [1], [2], [0, 0, 0, 1, 1, 2], [0], [0]>} : vector<2x8x8xbf16>, vector<2x8x8xbf16>, vector<2x8x8xf32> -> vector<2x8x8xf32>
    "tpu.trace_stop"() : () -> ()
    %115 = vector.shape_cast %114 : vector<2x8x8xf32> to vector<16x8xf32>
    %116 = arith.truncf %115 : vector<16x8xf32> to vector<16x8xbf16>
    %c3 = arith.constant 3 : index
    %c0_33 = arith.constant 0 : index
    %c0_34 = arith.constant 0 : index
    %117 = vector.load %arg4[%c3, %c0_33, %c0_34] : memref<4x8x128xbf16, #tpu.memory_space<vmem>>, vector<1x8x128xbf16>
    %118 = vector.shape_cast %117 : vector<1x8x128xbf16> to vector<8x128xbf16>
    %cst_35 = arith.constant dense<0.000000e+00> : vector<16x128xf32>
    %119 = tpu.matmul %116, %118, %cst_35 {dimension_numbers = #tpu.dot_dimension_numbers<[1], [0], [0], [1], [0, 0, 1, 1], [], []>} : vector<16x8xbf16>, vector<8x128xbf16>, vector<16x128xf32> -> vector<16x128xf32>
    %120 = arith.addf %92, %119 : vector<16x128xf32>
    %c0_36 = arith.constant 0 : index
    %c0_37 = arith.constant 0 : index
    %121 = vector.load %arg5[%c0_36, %c0_37] : memref<1x128xf32, #tpu.memory_space<vmem>>, vector<1x128xf32>
    %122 = vector.broadcast %121 : vector<1x128xf32> to vector<16x128xf32>
    %123 = arith.addf %120, %122 : vector<16x128xf32>
    %124 = vector.shape_cast %123 : vector<16x128xf32> to vector<2x8x128xf32>
    %c0_38 = arith.constant 0 : index
    %c0_39 = arith.constant 0 : index
    %c0_40 = arith.constant 0 : index
    %125 = vector.load %arg6[%c0_38, %c0_39, %c0_40] : memref<2x8x128xf32, #tpu.memory_space<vmem>>, vector<2x8x128xf32>
    tpu.vector_store %arg6[%c0_38, %c0_39, %c0_40], %124 {strides = array<i32>} : memref<2x8x128xf32, #tpu.memory_space<vmem>>, vector<2x8x128xf32>,
    return
  }
  func.func @transform_0(%arg0: i32) -> (i32, i32, i32) {
    %c0_i32 = arith.constant 0 : i32
    %c0_i32_0 = arith.constant 0 : i32
    %c0_i32_1 = arith.constant 0 : i32
    return %arg0, %c0_i32, %c0_i32_0 : i32, i32, i32
  }
  func.func @transform_1(%arg0: i32) -> (i32, i32) {
    %c0_i32 = arith.constant 0 : i32
    %c0_i32_0 = arith.constant 0 : i32
    %c0_i32_1 = arith.constant 0 : i32
    return %c0_i32, %c0_i32_0 : i32, i32
  }
  func.func @transform_2(%arg0: i32) -> (i32, i32) {
    %c0_i32 = arith.constant 0 : i32
    %c0_i32_0 = arith.constant 0 : i32
    %c0_i32_1 = arith.constant 0 : i32
    return %c0_i32, %c0_i32_0 : i32, i32
  }
  func.func @transform_3(%arg0: i32) -> (i32, i32, i32) {
    %c0_i32 = arith.constant 0 : i32
    %c0_i32_0 = arith.constant 0 : i32
    %c0_i32_1 = arith.constant 0 : i32
    %c0_i32_2 = arith.constant 0 : i32
    return %c0_i32, %c0_i32_0, %c0_i32_1 : i32, i32, i32
  }
  func.func @transform_4(%arg0: i32) -> (i32, i32) {
    %c0_i32 = arith.constant 0 : i32
    %c0_i32_0 = arith.constant 0 : i32
    %c0_i32_1 = arith.constant 0 : i32
    return %c0_i32, %c0_i32_0 : i32, i32
  }
  func.func @transform_5(%arg0: i32) -> (i32, i32, i32) {
    %c0_i32 = arith.constant 0 : i32
    %c0_i32_0 = arith.constant 0 : i32
    %c0_i32_1 = arith.constant 0 : i32
    return %arg0, %c0_i32, %c0_i32_0 : i32, i32, i32
  }
}

</mosaic_0001>

<bundles_post_ra>
// kernel: tpu_custom_call.1
= control target key start
LH: loop header
LB: loop body
LE: loop exit
PB: predicated region body
PF: predicated region fallthrough
CT: control target
= control target key end

     0   :  { %s1013_s0 = inlined_call_operand.vmem [shape: f32[2,8,128], index: 0, kind: input, shape index: {}]   ;;  %s1014_s1 = inlined_call_operand.vmem [shape: bf16[128,96], index: 1, kind: input, shape index: {}]   ;;  %s1015_s2 = inlined_call_operand.vmem [shape: f32[1,96], index: 2, kind: input, shape index: {}]   ;;  %s1016_s3 = inlined_call_operand.vmem [shape: bf16[4,8,128], index: 3, kind: input, shape index: {}]   ;;  %s1017_s4 = inlined_call_operand.vmem [shape: f32[1,128], index: 4, kind: input, shape index: {}]   ;;  %s1018_s5 = inlined_call_operand.hbm [shape: f32[2,8,128], index: 5, kind: output, shape index: {}]  }
   0x1   :  { %v744_v0 = vld [vmem:[%s1014_s1 + $0x38] sm:$0xff]  ;;  %v743_v1 = vld [vmem:[%s1014_s1 + $0x30] sm:$0xff] }
   0x2   :  { %93 = vmatpush.bf16.msra.mxu0 %v744_v0 }
   0x3   :  { %10 = vsyncpa [#allocation3], 0  ;;  %v742_v2 = vld [vmem:[%s1014_s1 + $0x28] sm:$0xff]  ;;  %v741_v3 = vld [vmem:[%s1014_s1 + $0x20] sm:$0xff]  ;;  %s820_s15 = smov 96   ;;  %vm114_vm0 = vcmask 64512  }
   0x4   :  { %v740_v4 = vld [vmem:[%s1014_s1 + $0x18] sm:$0xff]  ;;  %v739_v5 = vld [vmem:[%s1014_s1 + $0x10] sm:$0xff]  ;;  %v738_v6 = vld [vmem:[%s1014_s1 + $0x8] sm:$0xff]  ;;  %s823_s16 = smov 80   ;;  %s824_s17 = smov 112   ;;  %vm187_vm1 = vcmask 1043456  }
   0x5   :  { %v737_v7 = vld [vmem:[%s1014_s1] sm:$0xff]  ;;  %v23_v9 = vld [vmem:[%s1013_s0 + $0x8] sm:$0xff]  ;;  %s819_s1 = smov 88   ;;  %s825_s18 = smov 56  }
   0x6   :  { %94 = vmatpush.bf16.msra.mxu0 %v743_v1  ;;  %v22_v8 = vld [vmem:[%s1013_s0] sm:$0xff]  ;;  %s821_s0 = smov 120   ;;  %s826_s19 = smov 72  }
   0x7   :  { %v24_v10 = vpack.c.bf16 %v23_v9, %v22_v8  ;;  %v759_v11 = vld [vmem:[%s1015_s2] ss:$0 sm:$0xff]  ;;  %s822_s2 = smov 64   ;;  %s827_s20 = smov 48  }
   0x8   :  { %s828_s21 = smov 104   ;;  %s829_s26 = smov 40  }
   0x9   :  { %s670_s11 = sshll.u32 %s1018_s5, 4  ;;  %s832_s12 = smov 8   ;;  %s671_s11 = int_to_ptr.hbm [resolvable:$true] %s670_s11 }
   0xa   :  { %95 = vmatpush.bf16.msra.mxu0 %v742_v2 }
   0xe   :  { %96 = vmatpush.bf16.msra.mxu0 %v741_v3 }
  0x12   :  { %97 = vmatpush.bf16.msra.mxu0 %v740_v4 }
  0x16   :  { %98 = vmatpush.bf16.msra.mxu0 %v739_v5 }
  0x1a   :  { %99 = vmatpush.bf16.msra.mxu0 %v738_v6 }
  0x1e   :  { %100 = vmatpush.bf16.msra.mxu0 %v737_v7 }
  0x21   :  { %101 = vmatmul.bf16.vlgmr.msra.gmra.mxu0 %v24_v10 }
  0x9e   :  { %v102_v12 = vpop.f32.mrf.mxu0 }
  0x9f   :  { %v103_v13 = vadd.f32 %v759_v11, %v102_v12 }
  0xa1   :  { %v107_v14 = vpack.c.bf16 %v103_v13, %v103_v13 }
  0xa3   :  { %v110_v15 = vunpack.c.l.b16 %v107_v14 }
  0xa5   :  { %v896_v16 = vpack.c.b16 %v110_v15, %v110_v15 }
  0xa6   :  { %v104_v17 = vpop.f32.mrf.mxu0 }
  0xa7   :  { %v105_v18 = vadd.f32 %v759_v11, %v104_v17  ;;  %229 = vrot.lane.b32.xlu1 %v896_v16, %s819_s1  ;;  %112 = vrot.lane.b32.xlu0 %v896_v16, %s820_s15 }
  0xa9   :  { %v108_v19 = vpack.c.bf16 %v105_v18, %v105_v18 }
  0xab   :  { %v135_v20 = vunpack.c.l.b16 %v108_v19 }
  0xad   :  { %v900_v21 = vpack.c.b16 %v135_v20, %v135_v20 }
  0xaf   :  { %252 = vrot.lane.b32.xlu2 %v900_v21, %s819_s1  ;;  %227 = vrot.lane.b32.xlu1 %v896_v16, %s821_s0 }
  0xb0   :  { %137 = vrot.lane.b32.xlu0 %v900_v21, %s820_s15 }
  0xb7   :  { %250 = vrot.lane.b32.xlu2 %v900_v21, %s821_s0 }
 0x109   :  { %v253_v26 = vpop.permute.xlu2 %252 }
 0x10a   :  { %v258_v29 = vsel %vm114_vm0, %v253_v26, 0 }
 0x111   :  { %v251_v31 = vpop.permute.xlu2 %250 }
 0x119   :  { %v230_v22 = vpop.permute.xlu1 %229  ;;  %v113_v23 = vpop.permute.xlu0 %112 }
 0x11a   :  { %v119_v24 = vsel %vm114_vm0, %v113_v23, 0  ;;  %v235_v25 = vsel %vm114_vm0, %v230_v22, 0 }
 0x11b   :  { %128 = vmatpush.bf16.xpose.msra.mxu1 %v119_v24 }
 0x121   :  { %v228_v30 = vpop.permute.xlu1 %227 }
 0x122   :  { %v138_v27 = vpop.permute.xlu0 %137  ;;  %714 = vmatmul.msk.bf16.vlgmr.msra.gmra.mxu1 %vm114_vm0, %v107_v14 }
 0x123   :  { %244 = vmatpush.bf16.xpose.msrb.mxu1 %v235_v25  ;;  %v143_v28 = vsel %vm114_vm0, %v138_v27, 0  ;;  %v226_v27 = vld [vmem:[%s1016_s3] sm:$0xf] }
 0x124   :  { %152 = vmatpush.bf16.xpose.msra.mxu2 %v143_v28  ;;  %v366_v28 = vsel %vm187_vm1, %v226_v27, 0 }
 0x125   :  { %375 = vmatpush.bf16.msrb.mxu0 %v366_v28 }
 0x12b   :  { %715 = vmatmul.msk.bf16.vlgmr.msra.gmra.mxu2 %vm114_vm0, %v108_v19 }
 0x12c   :  { %267 = vmatpush.bf16.xpose.msrb.mxu2 %v258_v29 }
 0x132   :  { %718 = vmatmul.msk.bf16.vlgmr.msrb.gmra.mxu1 %vm114_vm0, %v228_v30 }
 0x13b   :  { %719 = vmatmul.msk.bf16.vlgmr.msrb.gmra.mxu2 %vm114_vm0, %v251_v31 }
 0x19f   :  { %v130_v32 = vpop.f32.mrf.mxu1 }
 0x1a0   :  { %v158_v33 = vsel %vm114_vm0, %v130_v32, -inf }
 0x1a1   :  { %159 = vmax.xlane.f32.xlu0 %v158_v33 }
 0x1a7   :  { %v132_v34 = vpop.f32.mrf.mxu1 }
 0x1a8   :  { %v722_v34 = vld [vmem:[%s1016_s3 + $0x4] sm:$0xf] }
 0x1ae   :  { %v154_v35 = vpop.f32.mrf.mxu2 }
 0x1af   :  { %v246_v36 = vpop.f32.mrf.mxu1  ;;  %v161_v37 = vsel %vm114_vm0, %v154_v35, -inf }
 0x1b0   :  { %162 = vmax.xlane.f32.xlu1 %v161_v37  ;;  %v273_v38 = vsel %vm114_vm0, %v246_v36, -inf }
 0x1b1   :  { %274 = vmax.xlane.f32.xlu2 %v273_v38 }
 0x1b5   :  { %182 = vrot.lane.b32.xlu0 %v896_v16, %s822_s2 }
 0x1b6   :  { %v156_v39 = vpop.f32.mrf.mxu2 }
 0x1b7   :  { %v248_v40 = vpop.f32.mrf.mxu1 }
 0x1bd   :  { %384 = vrot.lane.b32.xlu0 %v896_v16, %s823_s16 }
 0x1be   :  { %v921_v41 = vpop.f32.mrf.mxu2 }
 0x1bf   :  { %v276_v60 = vsel %vm114_vm0, %v921_v41, -inf }
 0x1c5   :  { %382 = vrot.lane.b32.xlu0 %v896_v16, %s824_s17 }
 0x1c6   :  { %v271_v42 = vpop.f32.mrf.mxu2 }
 0x214   :  { %v160_v43 = vpop.xlane.xlu0 %159 }
 0x215   :  { %v164_v44 = vsub.f32 %v130_v32, %v160_v43 }
 0x217   :  { %v166_v45 = vmul.f32 1.442695, %v164_v44 }
 0x219   :  { %761 = vpow2.f32 %v166_v45 }
 0x21f   :  { %v762_v46 = vpop.eup %761 }
 0x220   :  { %v170_v47 = vsel %vm114_vm0, %v762_v46, 0.0 }
 0x221   :  { %171 = vadd.xlane.f32.xlu2 %v170_v47 }
 0x223   :  { %v163_v48 = vpop.xlane.xlu1 %162 }
 0x224   :  { %v165_v49 = vsub.f32 %v154_v35, %v163_v48  ;;  %v275_v50 = vpop.xlane.xlu2 %274  ;;  %v346_v35 = vsel %vm187_vm1, %v722_v34, 0 }
 0x225   :  { %v279_v52 = vsub.f32 %v246_v36, %v275_v50  ;;  %355 = vmatpush.bf16.msra.mxu2 %v346_v35 }
 0x226   :  { %v168_v51 = vmul.f32 1.442695, %v165_v49 }
 0x227   :  { %v183_v53 = vpop.permute.xlu0 %182  ;;  %v281_v55 = vmul.f32 1.442695, %v279_v52 }
 0x228   :  { %763 = vpow2.f32 %v168_v51  ;;  %v189_v54 = vsel %vm187_vm1, %v183_v53, 0 }
 0x229   :  { %198 = vmatpush.bf16.msra.mxu3 %v189_v54  ;;  %765 = vpow2.f32 %v281_v55 }
 0x22e   :  { %v764_v56 = vpop.eup %763 }
 0x22f   :  { %v173_v57 = vsel %vm114_vm0, %v764_v56, 0.0  ;;  %v766_v58 = vpop.eup %765  ;;  %v385_v9 = vpop.permute.xlu0 %384 }
 0x230   :  { %174 = vadd.xlane.f32.xlu1 %v173_v57  ;;  %v285_v59 = vsel %vm114_vm0, %v766_v58, 0.0  ;;  %v390_v13 = vsel %vm114_vm0, %v385_v9, 0 }
 0x237   :  { %v383_v23 = vpop.permute.xlu0 %382 }
 0x238   :  { %286 = vadd.xlane.f32.xlu1 %v285_v59 }
 0x239   :  { %204 = vrot.lane.b32.xlu2 %v900_v21, %s822_s2 }
 0x251   :  { %297 = vrot.lane.b32.xlu1 %v896_v16, %s825_s18 }
 0x259   :  { %318 = vrot.lane.b32.xlu1 %v900_v21, %s825_s18 }
 0x261   :  { %407 = vrot.lane.b32.xlu1 %v900_v21, %s823_s16 }
 0x262   :  { %277 = vmax.xlane.f32.xlu2 %v276_v60 }
 0x269   :  { %405 = vrot.lane.b32.xlu1 %v900_v21, %s824_s17 }
 0x27a   :  { %544 = vrot.lane.b32.xlu2 %v900_v21, %s826_s19 }
 0x294   :  { %v172_v61 = vpop.xlane.xlu2 %171 }
 0x295   :  { %767 = vrcp.f32 %v172_v61 }
 0x29b   :  { %v768_v62 = vpop.eup %767 }
 0x29c   :  { %v205_v63 = vpop.permute.xlu2 %204  ;;  %v178_v0 = vmul.f32 %v768_v62, %v762_v46 }
 0x29d   :  { %v210_v1 = vsel %vm187_vm1, %v205_v63, 0 }
 0x29e   :  { %219 = vmatpush.bf16.msrb.mxu3 %v210_v1  ;;  %v180_v2 = vpack.c.bf16 %v178_v0, %v178_v0 }
 0x2a0   :  { %716 = vmatmul.msk.bf16.vlgmr.msra.gmra.mxu3 %vm114_vm0, %v180_v2 }
 0x2a3   :  { %v175_v3 = vpop.xlane.xlu1 %174 }
 0x2a4   :  { %769 = vrcp.f32 %v175_v3 }
 0x2aa   :  { %v770_v4 = vpop.eup %769 }
 0x2ab   :  { %v179_v5 = vmul.f32 %v770_v4, %v764_v56  ;;  %v287_v7 = vpop.xlane.xlu1 %286 }
 0x2ac   :  { %771 = vrcp.f32 %v287_v7 }
 0x2ad   :  { %v181_v6 = vpack.c.bf16 %v179_v5, %v179_v5 }
 0x2b0   :  { %717 = vmatmul.msk.bf16.vlgmr.msrb.gmra.mxu3 %vm114_vm0, %v181_v6 }
 0x2b2   :  { %v772_v8 = vpop.eup %771 }
 0x2b3   :  { %v293_v10 = vmul.f32 %v772_v8, %v766_v58 }
 0x2b5   :  { %v295_v14 = vpack.c.bf16 %v293_v10, %v293_v10 }
 0x2c3   :  { %v298_v11 = vpop.permute.xlu1 %297 }
 0x2c4   :  { %v303_v12 = vsel %vm187_vm1, %v298_v11, 0 }
 0x2c5   :  { %312 = vmatpush.bf16.msra.mxu3 %v303_v12 }
 0x2c8   :  { %720 = vmatmul.msk.bf16.vlgmr.msra.gmra.mxu3 %vm114_vm0, %v295_v14 }
 0x2c9   :  { %399 = vmatpush.bf16.xpose.msrb.mxu3 %v390_v13 }
 0x2cb   :  { %v319_v15 = vpop.permute.xlu1 %318 }
 0x2cc   :  { %v324_v17 = vsel %vm187_vm1, %v319_v15, 0 }
 0x2cd   :  { %333 = vmatpush.bf16.msra.mxu1 %v324_v17 }
 0x2d3   :  { %v408_v18 = vpop.permute.xlu1 %407 }
 0x2d4   :  { %v413_v19 = vsel %vm114_vm0, %v408_v18, 0 }
 0x2d5   :  { %422 = vmatpush.bf16.xpose.msrb.mxu1 %v413_v19  ;;  %v278_v20 = vpop.xlane.xlu2 %277 }
 0x2d6   :  { %v280_v22 = vsub.f32 %v921_v41, %v278_v20 }
 0x2d8   :  { %v283_v24 = vmul.f32 1.442695, %v280_v22  ;;  %725 = vmatmul.msk.bf16.vlgmr.msrb.gmra.mxu3 %vm114_vm0, %v383_v23 }
 0x2da   :  { %773 = vpow2.f32 %v283_v24 }
 0x2db   :  { %v406_v47 = vpop.permute.xlu1 %405 }
 0x2dd   :  { %v545_v57 = vpop.permute.xlu2 %544 }
 0x2de   :  { %v550_v60 = vsel %vm114_vm0, %v545_v57, 0 }
 0x2e0   :  { %v774_v25 = vpop.eup %773 }
 0x2e1   :  { %v288_v26 = vsel %vm114_vm0, %v774_v25, 0.0 }
 0x2e2   :  { %289 = vadd.xlane.f32.xlu0 %v288_v26 }
 0x2f6   :  { %452 = vrot.lane.b32.xlu0 %v896_v16, %s827_s20 }
 0x2fe   :  { %542 = vrot.lane.b32.xlu0 %v900_v21, %s828_s21 }
 0x306   :  { %519 = vrot.lane.b32.xlu0 %v896_v16, %s828_s21 }
 0x30e   :  { %473 = vrot.lane.b32.xlu0 %v900_v21, %s827_s20 }
 0x323   :  { %v200_v29 = vpop.f32.mrf.mxu3 }
 0x32b   :  { %v202_v30 = vpop.f32.mrf.mxu3 }
 0x333   :  { %v221_v31 = vpop.f32.mrf.mxu3 }
 0x334   :  { %v225_v32 = vpack.c.bf16 %v221_v31, %v200_v29  ;;  %v729_v29 = vld [vmem:[%s1016_s3 + $0x8] sm:$0xf] }
 0x335   :  { %v501_v30 = vsel %vm187_vm1, %v729_v29, 0 }
 0x336   :  { %724 = vmatmul.msk.bf16.vlgmr.msrb.gmra.mxu0 %vm114_vm0, %v225_v32  ;;  %510 = vmatpush.bf16.msra.mxu3 %v501_v30 }
 0x33b   :  { %v223_v33 = vpop.f32.mrf.mxu3 }
 0x34b   :  { %v314_v36 = vpop.f32.mrf.mxu3 }
 0x353   :  { %v316_v37 = vpop.f32.mrf.mxu3 }
 0x355   :  { %v290_v38 = vpop.xlane.xlu0 %289 }
 0x356   :  { %775 = vrcp.f32 %v290_v38 }
 0x35b   :  { %v401_v39 = vpop.f32.mrf.mxu3 }
 0x35c   :  { %v776_v40 = vpop.eup %775  ;;  %v428_v41 = vsel %vm114_vm0, %v401_v39, -inf }
 0x35d   :  { %v294_v42 = vmul.f32 %v776_v40, %v774_v25  ;;  %429 = vmax.xlane.f32.xlu1 %v428_v41 }
 0x35f   :  { %v296_v43 = vpack.c.bf16 %v294_v42, %v294_v42 }
 0x361   :  { %721 = vmatmul.msk.bf16.vlgmr.msra.gmra.mxu1 %vm114_vm0, %v296_v43 }
 0x363   :  { %v403_v44 = vpop.f32.mrf.mxu3 }
 0x368   :  { %v453_v45 = vpop.permute.xlu0 %452 }
 0x369   :  { %v458_v46 = vsel %vm187_vm1, %v453_v45, 0 }
 0x36a   :  { %467 = vmatpush.bf16.msrb.mxu2 %v458_v46 }
 0x370   :  { %v543_v48 = vpop.permute.xlu0 %542 }
 0x371   :  { %726 = vmatmul.msk.bf16.vlgmr.msrb.gmra.mxu1 %vm114_vm0, %v406_v47 }
 0x378   :  { %v520_v49 = vpop.permute.xlu0 %519 }
 0x380   :  { %v474_v50 = vpop.permute.xlu0 %473 }
 0x381   :  { %v479_v51 = vsel %vm187_vm1, %v474_v50, 0 }
 0x382   :  { %488 = vmatpush.bf16.msra.mxu0 %v479_v51 }
 0x3b3   :  { %v377_v34 = vpop.f32.mrf.mxu0 }
 0x3bb   :  { %v379_v37 = vpop.f32.mrf.mxu0 }
 0x3d0   :  { %v430_v52 = vpop.xlane.xlu1 %429 }
 0x3d1   :  { %v434_v53 = vsub.f32 %v401_v39, %v430_v52 }
 0x3d3   :  { %v436_v54 = vmul.f32 1.442695, %v434_v53 }
 0x3d5   :  { %777 = vpow2.f32 %v436_v54 }
 0x3db   :  { %v778_v55 = vpop.eup %777 }
 0x3dc   :  { %v440_v56 = vsel %vm114_vm0, %v778_v55, 0.0 }
 0x3dd   :  { %441 = vadd.xlane.f32.xlu2 %v440_v56 }
 0x3de   :  { %v335_v58 = vpop.f32.mrf.mxu1 }
 0x3df   :  { %v339_v59 = vpack.c.bf16 %v335_v58, %v314_v36 }
 0x3e1   :  { %723 = vmatmul.msk.bf16.vlgmr.msra.gmra.mxu2 %vm114_vm0, %v339_v59  ;;  %v735_v59 = vld [vmem:[%s1016_s3 + $0xc] sm:$0xf]  ;;  %s830_s3 = smov [#allocation2]  }
 0x3e2   :  { %559 = vmatpush.bf16.xpose.msra.mxu2 %v550_v60  ;;  %v638_v60 = vsel %vm187_vm1, %v735_v59, 0  ;;  %s668_s8 = sshll.u32 %s830_s3, 4  ;;  %s669_s8 = int_to_ptr.vmem [resolvable:$true] %s668_s8 }
 0x3e6   :  { %v337_v61 = vpop.f32.mrf.mxu1 }
 0x3ee   :  { %v424_v62 = vpop.f32.mrf.mxu1 }
 0x3ef   :  { %v431_v63 = vsel %vm114_vm0, %v424_v62, -inf }
 0x3f0   :  { %432 = vmax.xlane.f32.xlu1 %v431_v63 }
 0x3f5   :  { %521 = vrot.lane.b32.xlu2 %v896_v16, %s826_s19 }
 0x3f6   :  { %v426_v0 = vpop.f32.mrf.mxu1 }
 0x450   :  { %v442_v1 = vpop.xlane.xlu2 %441 }
 0x451   :  { %779 = vrcp.f32 %v442_v1 }
 0x457   :  { %v780_v2 = vpop.eup %779 }
 0x458   :  { %v448_v3 = vmul.f32 %v780_v2, %v778_v55  ;;  %v522_v4 = vpop.permute.xlu2 %521  ;;  %v760_v2 = vld [vmem:[%s1017_s4] ss:$0 sm:$0xff]  ;;  %s831_s4 = smov 128  }
 0x459   :  { %v527_v5 = vsel %vm114_vm0, %v522_v4, 0 }
 0x45a   :  { %v450_v6 = vpack.c.bf16 %v448_v3, %v448_v3  ;;  %536 = vmatpush.bf16.xpose.msra.mxu1 %v527_v5 }
 0x45c   :  { %727 = vmatmul.msk.bf16.vlgmr.msrb.gmra.mxu2 %vm114_vm0, %v450_v6 }
 0x461   :  { %731 = vmatmul.msk.bf16.vlgmr.msra.gmra.mxu1 %vm114_vm0, %v520_v49 }
 0x462   :  { %647 = vmatpush.bf16.msrb.mxu1 %v638_v60 }
 0x463   :  { %v433_v7 = vpop.xlane.xlu1 %432 }
 0x464   :  { %v435_v8 = vsub.f32 %v424_v62, %v433_v7  ;;  %v357_v12 = vpop.f32.mrf.mxu2 }
 0x465   :  { %v378_v51 = vadd.f32 %v377_v34, %v357_v12 }
 0x466   :  { %v438_v9 = vmul.f32 1.442695, %v435_v8 }
 0x468   :  { %781 = vpow2.f32 %v438_v9 }
 0x46c   :  { %732 = vmatmul.msk.bf16.vlgmr.msra.gmra.mxu2 %vm114_vm0, %v543_v48  ;;  %v983_v13 = vpop.f32.mrf.mxu2 }
 0x46d   :  { %v380_v6 = vadd.f32 %v379_v37, %v983_v13 }
 0x46e   :  { %v782_v10 = vpop.eup %781 }
 0x46f   :  { %v443_v11 = vsel %vm114_vm0, %v782_v10, 0.0 }
 0x470   :  { %444 = vadd.xlane.f32.xlu2 %v443_v11 }
 0x488   :  { %589 = vrot.lane.b32.xlu2 %v896_v16, %s829_s26 }
 0x4de   :  { %v538_v14 = vpop.f32.mrf.mxu1 }
 0x4df   :  { %v469_v15 = vpop.f32.mrf.mxu2  ;;  %v565_v17 = vsel %vm114_vm0, %v538_v14, -inf }
 0x4e0   :  { %566 = vmax.xlane.f32.xlu0 %v565_v17 }
 0x4e3   :  { %v445_v18 = vpop.xlane.xlu2 %444 }
 0x4e4   :  { %783 = vrcp.f32 %v445_v18 }
 0x4e6   :  { %v540_v19 = vpop.f32.mrf.mxu1 }
 0x4e7   :  { %v471_v20 = vpop.f32.mrf.mxu2 }
 0x4ea   :  { %v784_v22 = vpop.eup %783 }
 0x4eb   :  { %v449_v23 = vmul.f32 %v784_v22, %v782_v10  ;;  %v590_v24 = vpop.permute.xlu2 %589 }
 0x4ec   :  { %v595_v25 = vsel %vm187_vm1, %v590_v24, 0 }
 0x4ed   :  { %v451_v26 = vpack.c.bf16 %v449_v23, %v449_v23  ;;  %604 = vmatpush.bf16.msrb.mxu0 %v595_v25 }
 0x4ef   :  { %v561_v16 = vpop.f32.mrf.mxu2  ;;  %728 = vmatmul.msk.bf16.vlgmr.msra.gmra.mxu0 %vm114_vm0, %v451_v26 }
 0x4f0   :  { %v568_v27 = vsel %vm114_vm0, %v561_v16, -inf }
 0x4f1   :  { %569 = vmax.xlane.f32.xlu1 %v568_v27 }
 0x4f7   :  { %v563_v28 = vpop.f32.mrf.mxu2 }
 0x553   :  { %v567_v31 = vpop.xlane.xlu0 %566 }
 0x554   :  { %v571_v32 = vsub.f32 %v538_v14, %v567_v31 }
 0x556   :  { %v573_v33 = vmul.f32 1.442695, %v571_v32 }
 0x558   :  { %785 = vpow2.f32 %v573_v33 }
 0x55e   :  { %v786_v35 = vpop.eup %785 }
 0x55f   :  { %v577_v36 = vsel %vm114_vm0, %v786_v35, 0.0 }
 0x560   :  { %578 = vadd.xlane.f32.xlu1 %v577_v36 }
 0x564   :  { %v570_v38 = vpop.xlane.xlu1 %569 }
 0x565   :  { %v572_v39 = vsub.f32 %v561_v16, %v570_v38 }
 0x567   :  { %v575_v40 = vmul.f32 1.442695, %v572_v39 }
 0x569   :  { %787 = vpow2.f32 %v575_v40 }
 0x56c   :  { %v490_v41 = vpop.f32.mrf.mxu0 }
 0x56d   :  { %v494_v42 = vpack.c.bf16 %v490_v41, %v469_v15 }
 0x56f   :  { %v788_v43 = vpop.eup %787  ;;  %730 = vmatmul.msk.bf16.vlgmr.msra.gmra.mxu3 %vm114_vm0, %v494_v42 }
 0x570   :  { %v580_v44 = vsel %vm114_vm0, %v788_v43, 0.0 }
 0x571   :  { %581 = vadd.xlane.f32.xlu1 %v580_v44 }
 0x574   :  { %v492_v45 = vpop.f32.mrf.mxu0 }
 0x58a   :  { %610 = vrot.lane.b32.xlu1 %v900_v21, %s829_s26 }
 0x5d3   :  { %v579_v46 = vpop.xlane.xlu1 %578 }
 0x5d4   :  { %789 = vrcp.f32 %v579_v46 }
 0x5da   :  { %v790_v47 = vpop.eup %789 }
 0x5db   :  { %v585_v48 = vmul.f32 %v790_v47, %v786_v35 }
 0x5dd   :  { %v587_v49 = vpack.c.bf16 %v585_v48, %v585_v48 }
 0x5df   :  { %733 = vmatmul.msk.bf16.vlgmr.msrb.gmra.mxu0 %vm114_vm0, %v587_v49 }
 0x5e4   :  { %v582_v50 = vpop.xlane.xlu1 %581 }
 0x5e5   :  { %791 = vrcp.f32 %v582_v50 }
 0x5eb   :  { %v792_v54 = vpop.eup %791 }
 0x5ec   :  { %v586_v55 = vmul.f32 %v792_v54, %v788_v43 }
 0x5ee   :  { %v588_v58 = vpack.c.bf16 %v586_v55, %v586_v55 }
 0x5f2   :  { %v512_v52 = vpop.f32.mrf.mxu3 }
 0x5f3   :  { %v517_v53 = vadd.f32 %v512_v52, %v378_v51 }
 0x5fa   :  { %v514_v62 = vpop.f32.mrf.mxu3 }
 0x5fb   :  { %v518_v7 = vadd.f32 %v514_v62, %v380_v6 }
 0x5fc   :  { %v611_v56 = vpop.permute.xlu1 %610 }
 0x5fd   :  { %v616_v57 = vsel %vm187_vm1, %v611_v56, 0 }
 0x5fe   :  { %625 = vmatpush.bf16.msrb.mxu3 %v616_v57 }
 0x601   :  { %734 = vmatmul.msk.bf16.vlgmr.msrb.gmra.mxu3 %vm114_vm0, %v588_v58 }
 0x65c   :  { %v606_v21 = vpop.f32.mrf.mxu0 }
 0x664   :  { %v608_v61 = vpop.f32.mrf.mxu0 }
 0x684   :  { %v627_v63 = vpop.f32.mrf.mxu3 }
 0x685   :  { %v631_v0 = vpack.c.bf16 %v627_v63, %v606_v21 }
 0x687   :  { %736 = vmatmul.msk.bf16.vlgmr.msrb.gmra.mxu1 %vm114_vm0, %v631_v0 }
 0x68c   :  { %v629_v1 = vpop.f32.mrf.mxu3 }
 0x704   :  { %v649_v3 = vpop.f32.mrf.mxu1 }
 0x705   :  { %v654_v4 = vadd.f32 %v649_v3, %v517_v53 }
 0x707   :  { %v660_v5 = vadd.f32 %v760_v2, %v654_v4 }
 0x709   :  { %662 = vst [vmem:[#allocation2] sm:$0xff] %v660_v5 }
 0x70c   :  { %v651_v8 = vpop.f32.mrf.mxu1 }
 0x70d   :  { %v655_v9 = vadd.f32 %v651_v8, %v518_v7 }
 0x70f   :  { %v661_v10 = vadd.f32 %v760_v2, %v655_v9 }
 0x711   :  { %663 = vst [vmem:[#allocation2 + $0x8] sm:$0xff] %v661_v10 }
 0x712   :  { %676 = dma.vmem_to_hbm [thread:$0]  %s669_s8, 256, %s671_s11, [#allocation3], %s831_s4, %s831_s4, %s832_s12  }
 0x713   :  { %817 = dma.done.wait [#allocation3], 256  }
 0x714   :  { %818 = vsyncadd [#allocation3], 4294967040 }
 0x715   :  { %681 = vsyncpa [#allocation3], 1 }

</bundles_post_ra>
